<compile_context>
chip_gen: v5e
topology: v5e:2x2
jax: 0.10.0
libtpu: 0.0.40
codegen_flags: <defaults>
</compile_context>

<pallas_src>
import functools

import jax
import jax.numpy as jnp
from jax import lax
from jax.experimental import pallas as pl
from jax.experimental.pallas import tpu as pltpu

BN_EPS = 1e-5
KW = 3  # conv kernel width, kernel_size = (1, 3)


def _convblock_kernel(x_ref, w_ref, gamma_ref, beta_ref, o_ref, rhs_ref, *,
                      W, W_out):
    """Fused Conv(1x3, valid) -> BatchNorm2d (batch stats) -> ReLU.

    x_ref:     (N, Cin_pad, H*W)      f32  NCHW, channels zero-padded to a full
                                           sublane tile, spatial on lanes.
    w_ref:     (Cout, KW*Cin_pad)     bf16 w_ref[co, k*Cin_pad + ci] =
                                           conv_w[co, ci, 0, k] (0 for padding).
    gamma_ref: (Cout, 1)              f32
    beta_ref:  (Cout, 1)              f32
    o_ref:     (N, Cout, H*W)         f32  columns with (p % W) >= W_out are
                                           don't-care (sliced off by wrapper).
    rhs_ref:   (KW*Cin_pad, N*H*W)    f32  VMEM scratch for the im2col RHS.
    """
    N, CP, HW = x_ref.shape
    H = HW // W
    NHW = N * HW

    # ---- im2col RHS via XLU rolls, tile-aligned scratch stores --------------
    # Row (k*CP + ci), column (n*HW + p) holds x[n, ci, (p + k) % HW].  For
    # valid output columns (p % W < W_out) the +k shift never crosses an H row
    # nor the sample boundary, so the cyclic lane rotation is exact there; the
    # wrapped tail only lands in don't-care columns (masked out of the BN
    # stats and sliced off in the wrapper).  NOTE: only valid for padding=0,
    # stride=1, kernel width KW — revisit if the conv config ever changes.
    for n in range(N):
        x_n = x_ref[n]                                     # (CP, HW), full tiles
        for k in range(KW):
            # positive shift HW-k == cyclic left-rotate by k (jnp.roll(x, -k)).
            tap = x_n if k == 0 else pltpu.roll(x_n, shift=HW - k, axis=1)
            rhs_ref[k * CP:(k + 1) * CP, n * HW:(n + 1) * HW] = tap

    # ---- conv: ONE bf16 MXU push (K = KW*Cin_pad), f32 accumulation ----------
    # (No conv-bias add: training-mode BN's mean subtraction cancels it.)
    acc = jnp.dot(w_ref[...], rhs_ref[...].astype(jnp.bfloat16),
                  preferred_element_type=jnp.float32)      # (Cout, N*HW) f32

    # ---- BN batch stats: two-pass (mean, centered sumsq), masked -------------
    ids = lax.broadcasted_iota(jnp.int32, (1, NHW), 1)
    if W & (W - 1) == 0:                     # W power of two -> cheap mask
        wpos = jnp.bitwise_and(ids, W - 1)
    else:
        wpos = ids % W
    valid = wpos < W_out                                    # (1, N*HW) bool
    count = float(N * H * W_out)
    mean = jnp.sum(jnp.where(valid, acc, 0.0), axis=1, keepdims=True) / count
    cen = jnp.where(valid, acc - mean, 0.0)                 # centered, masked
    var = jnp.sum(cen * cen, axis=1, keepdims=True) / count  # biased, >= 0

    # ---- folded per-channel scale/shift + ReLU, lane-dense stores ------------
    scale = gamma_ref[...] * lax.rsqrt(var + BN_EPS)        # (Cout, 1)
    shift = beta_ref[...] - mean * scale                    # (Cout, 1)
    y = jnp.maximum(acc * scale + shift, 0.0)               # (Cout, N*HW)
    for n in range(N):
        o_ref[n] = y[:, n * HW:(n + 1) * HW].astype(o_ref.dtype)


def conv_block_pallas(x_nchw, conv_w, conv_b, gamma, beta):
    """ConvBlock forward.  x_nchw: (N, Cin, H, W); conv_w: (Cout, Cin, 1, 3)."""
    N, Cin, H, W = x_nchw.shape
    Cout = conv_w.shape[0]
    assert W >= KW, "width must cover the (1,3) kernel"
    W_out = W - (KW - 1)
    HW = H * W
    CP = 8 * ((Cin + 7) // 8)  # pad channels to a full f32 sublane tile

    # Conv bias is exactly cancelled by training-mode BN mean subtraction.
    del conv_b

    # Free reshape + zero channel-pad (no activation transpose).  Padded
    # channels are zero AND get zero weight columns, so they contribute nothing.
    x_flat = x_nchw.reshape(N, Cin, HW).astype(jnp.float32)
    if CP != Cin:
        x_flat = jnp.pad(x_flat, ((0, 0), (0, CP - Cin), (0, 0)))

    # Tiny parameter re-pack: (Cout,Cin,1,3) -> (Cout, KW*CP), bf16 for a
    # single-pass MXU matmul (column order k*CP + ci, zeros for padded ci).
    w3 = jnp.transpose(conv_w[:, :, 0, :].astype(jnp.float32), (0, 2, 1))
    w3 = jnp.pad(w3, ((0, 0), (0, 0), (0, CP - Cin)))       # (Cout, KW, CP)
    w2 = w3.reshape(Cout, KW * CP).astype(jnp.bfloat16)
    g2 = gamma.reshape(Cout, 1).astype(jnp.float32)
    b2 = beta.reshape(Cout, 1).astype(jnp.float32)

    kernel = functools.partial(_convblock_kernel, W=W, W_out=W_out)

    # Whole toy problem fits in VMEM -> single grid-less invocation with
    # full-array blocks (block shape == array shape, so no (8,128) constraint).
    full = lambda s: pl.BlockSpec(s, lambda: (0,) * len(s))
    out_flat = pl.pallas_call(
        kernel,
        out_shape=jax.ShapeDtypeStruct((N, Cout, HW), jnp.float32),
        grid=(),
        in_specs=[full(x_flat.shape), full(w2.shape), full(g2.shape),
                  full(b2.shape)],
        out_specs=full((N, Cout, HW)),
        scratch_shapes=[pltpu.VMEM((KW * CP, N * HW), jnp.float32)],
    )(x_flat, w2, g2, b2)

    # Free reshape + cheap width slice back to the PyTorch NCHW contract.
    # At production shapes, hand the padded-W layout to the consumer instead
    # (the slice is an extra HBM read+write pass).
    return out_flat.reshape(N, Cout, H, W)[:, :, :, :W_out]


def conv_block_reference(x_nchw, conv_w, conv_b, gamma, beta):
    """Pure-JAX reference matching PyTorch ConvBlock (training-mode BN).

    Keeps the conv bias so the kernel's bias-cancellation is verified too.
    """
    y = lax.conv_general_dilated(
        x_nchw.astype(jnp.float32), conv_w.astype(jnp.float32),
        window_strides=(1, 1), padding=((0, 0), (0, 0)),
        dimension_numbers=("NCHW", "OIHW", "NCHW"))
    y = y + conv_b.reshape(1, -1, 1, 1)
    mean = jnp.mean(y, axis=(0, 2, 3), keepdims=True)
    var = jnp.mean((y - mean) ** 2, axis=(0, 2, 3), keepdims=True)  # biased
    y = (y - mean) / jnp.sqrt(var + BN_EPS)
    y = y * gamma.reshape(1, -1, 1, 1) + beta.reshape(1, -1, 1, 1)
    return jnp.maximum(y, 0.0)


if __name__ == "__main__":
    # Small shapes consistent with the module: N=2, Cin=4, H=W=16, Cout=8.
    N, CIN, H, W, COUT = 2, 4, 16, 16, 8

    key = jax.random.PRNGKey(0)
    kx, kw, kb, kg, kbe = jax.random.split(key, 5)

    x = jax.random.normal(kx, (N, CIN, H, W), dtype=jnp.float32)
    w_pt = 0.1 * jax.random.normal(kw, (COUT, CIN, 1, 3), dtype=jnp.float32)
    b = 0.1 * jax.random.normal(kb, (COUT,), dtype=jnp.float32)
    gamma = 1.0 + 0.1 * jax.random.normal(kg, (COUT,), dtype=jnp.float32)
    beta = 0.1 * jax.random.normal(kbe, (COUT,), dtype=jnp.float32)

    out = jax.jit(conv_block_pallas)(x, w_pt, b, gamma, beta)
    out = jax.block_until_ready(out)

    ref = conv_block_reference(x, w_pt, b, gamma, beta)
    assert out.shape == (N, COUT, H, W - 2), out.shape
    # Tolerance relaxed vs. the f32 version: the conv matmul now uses bf16
    # operands on the MXU (f32 accumulation).
    assert jnp.allclose(out, ref, atol=2e-2, rtol=2e-2), "mismatch vs reference"

    print("KERNEL_OK")
</pallas_src>

<mosaic_0001>
module attributes {stable_mosaic.version = 11 : i64} {
  func.func @_convblock_kernel(%arg0: memref<2x8x256xf32, #tpu.memory_space<vmem>>, %arg1: memref<8x24xbf16, #tpu.memory_space<vmem>>, %arg2: memref<8x1xf32, #tpu.memory_space<vmem>>, %arg3: memref<8x1xf32, #tpu.memory_space<vmem>>, %arg4: memref<2x8x256xf32, #tpu.memory_space<vmem>>, %arg5: memref<24x512xf32, #tpu.memory_space<vmem>>) attributes {dimension_semantics = [], scalar_prefetch = 0 : i64, scratch_operands = 1 : i64, tpu.core_type = #tpu.core_type<tc>} {
    %c0 = arith.constant 0 : index
    %c0_0 = arith.constant 0 : index
    %c0_1 = arith.constant 0 : index
    %0 = vector.load %arg0[%c0, %c0_0, %c0_1] : memref<2x8x256xf32, #tpu.memory_space<vmem>>, vector<1x8x256xf32>
    %1 = vector.shape_cast %0 : vector<1x8x256xf32> to vector<8x256xf32>
    %c0_2 = arith.constant 0 : index
    %c0_3 = arith.constant 0 : index
    %2 = vector.load %arg5[%c0_2, %c0_3] : memref<24x512xf32, #tpu.memory_space<vmem>>, vector<8x256xf32>
    tpu.vector_store %arg5[%c0_2, %c0_3], %1 {strides = array<i32>} : memref<24x512xf32, #tpu.memory_space<vmem>>, vector<8x256xf32>,
    %c255_i32 = arith.constant 255 : i32
    %3 = tpu.dynamic_rotate %1 by %c255_i32 dim 1 : vector<8x256xf32>, i32 -> vector<8x256xf32>
    %c8 = arith.constant 8 : index
    %c0_4 = arith.constant 0 : index
    %4 = vector.load %arg5[%c8, %c0_4] : memref<24x512xf32, #tpu.memory_space<vmem>>, vector<8x256xf32>
    tpu.vector_store %arg5[%c8, %c0_4], %3 {strides = array<i32>} : memref<24x512xf32, #tpu.memory_space<vmem>>, vector<8x256xf32>,
    %c254_i32 = arith.constant 254 : i32
    %5 = tpu.dynamic_rotate %1 by %c254_i32 dim 1 : vector<8x256xf32>, i32 -> vector<8x256xf32>
    %c16 = arith.constant 16 : index
    %c0_5 = arith.constant 0 : index
    %6 = vector.load %arg5[%c16, %c0_5] : memref<24x512xf32, #tpu.memory_space<vmem>>, vector<8x256xf32>
    tpu.vector_store %arg5[%c16, %c0_5], %5 {strides = array<i32>} : memref<24x512xf32, #tpu.memory_space<vmem>>, vector<8x256xf32>,
    %c1 = arith.constant 1 : index
    %c0_6 = arith.constant 0 : index
    %c0_7 = arith.constant 0 : index
    %7 = vector.load %arg0[%c1, %c0_6, %c0_7] : memref<2x8x256xf32, #tpu.memory_space<vmem>>, vector<1x8x256xf32>
    %8 = vector.shape_cast %7 : vector<1x8x256xf32> to vector<8x256xf32>
    %c0_8 = arith.constant 0 : index
    %c256 = arith.constant 256 : index
    %9 = vector.load %arg5[%c0_8, %c256] : memref<24x512xf32, #tpu.memory_space<vmem>>, vector<8x256xf32>
    tpu.vector_store %arg5[%c0_8, %c256], %8 {strides = array<i32>} : memref<24x512xf32, #tpu.memory_space<vmem>>, vector<8x256xf32>,
    %c255_i32_9 = arith.constant 255 : i32
    %10 = tpu.dynamic_rotate %8 by %c255_i32_9 dim 1 : vector<8x256xf32>, i32 -> vector<8x256xf32>
    %c8_10 = arith.constant 8 : index
    %c256_11 = arith.constant 256 : index
    %11 = vector.load %arg5[%c8_10, %c256_11] : memref<24x512xf32, #tpu.memory_space<vmem>>, vector<8x256xf32>
    tpu.vector_store %arg5[%c8_10, %c256_11], %10 {strides = array<i32>} : memref<24x512xf32, #tpu.memory_space<vmem>>, vector<8x256xf32>,
    %c254_i32_12 = arith.constant 254 : i32
    %12 = tpu.dynamic_rotate %8 by %c254_i32_12 dim 1 : vector<8x256xf32>, i32 -> vector<8x256xf32>
    %c16_13 = arith.constant 16 : index
    %c256_14 = arith.constant 256 : index
    %13 = vector.load %arg5[%c16_13, %c256_14] : memref<24x512xf32, #tpu.memory_space<vmem>>, vector<8x256xf32>
    tpu.vector_store %arg5[%c16_13, %c256_14], %12 {strides = array<i32>} : memref<24x512xf32, #tpu.memory_space<vmem>>, vector<8x256xf32>,
    %c0_15 = arith.constant 0 : index
    %c0_16 = arith.constant 0 : index
    %14 = vector.load %arg1[%c0_15, %c0_16] : memref<8x24xbf16, #tpu.memory_space<vmem>>, vector<8x24xbf16>
    %c0_17 = arith.constant 0 : index
    %c0_18 = arith.constant 0 : index
    %15 = vector.load %arg5[%c0_17, %c0_18] : memref<24x512xf32, #tpu.memory_space<vmem>>, vector<24x512xf32>
    %16 = arith.truncf %15 : vector<24x512xf32> to vector<24x512xbf16>
    %cst = arith.constant dense<0.000000e+00> : vector<8x512xf32>
    %17 = tpu.matmul %14, %16, %cst {dimension_numbers = #tpu.dot_dimension_numbers<[1], [0], [0], [1], [0, 0, 1, 1], [], []>} : vector<8x24xbf16>, vector<24x512xbf16>, vector<8x512xf32> -> vector<8x512xf32>
    %18 = tpu.iota {dimensions = array<i32: 1>} : vector<1x512xi32>
    %c15_i32 = arith.constant 15 : i32
    %19 = vector.broadcast %c15_i32 : i32 to vector<1x512xi32>
    %20 = arith.andi %18, %19 : vector<1x512xi32>
    %c14_i32 = arith.constant 14 : i32
    %21 = vector.broadcast %c14_i32 : i32 to vector<1x512xi32>
    %22 = arith.cmpi slt, %20, %21 : vector<1x512xi32>
    %cst_19 = arith.constant 0.000000e+00 : f32
    %23 = vector.shape_cast %22 : vector<1x512xi1> to vector<1x512xi1>
    %24 = vector.broadcast %23 : vector<1x512xi1> to vector<8x512xi1>
    %25 = vector.broadcast %cst_19 : f32 to vector<8x512xf32>
    %26 = arith.select %24, %17, %25 : vector<8x512xi1>, vector<8x512xf32>
    %cst_20 = arith.constant dense<0.000000e+00> : vector<8xf32>
    %27 = vector.multi_reduction <add>, %26, %cst_20 [1] : vector<8x512xf32> to vector<8xf32>
    %28 = vector.shape_cast %27 : vector<8xf32> to vector<8x1xf32>
    %cst_21 = arith.constant 4.480000e+02 : f32
    %29 = vector.broadcast %cst_21 : f32 to vector<8x1xf32>
    %30 = arith.divf %28, %29 : vector<8x1xf32>
    %31 = vector.broadcast %30 : vector<8x1xf32> to vector<8x512xf32>
    %32 = arith.subf %17, %31 : vector<8x512xf32>
    %cst_22 = arith.constant 0.000000e+00 : f32
    %33 = vector.shape_cast %22 : vector<1x512xi1> to vector<1x512xi1>
    %34 = vector.broadcast %33 : vector<1x512xi1> to vector<8x512xi1>
    %35 = vector.broadcast %cst_22 : f32 to vector<8x512xf32>
    %36 = arith.select %34, %32, %35 : vector<8x512xi1>, vector<8x512xf32>
    %37 = arith.mulf %36, %36 : vector<8x512xf32>
    %cst_23 = arith.constant dense<0.000000e+00> : vector<8xf32>
    %38 = vector.multi_reduction <add>, %37, %cst_23 [1] : vector<8x512xf32> to vector<8xf32>
    %39 = vector.shape_cast %38 : vector<8xf32> to vector<8x1xf32>
    %cst_24 = arith.constant 4.480000e+02 : f32
    %40 = vector.broadcast %cst_24 : f32 to vector<8x1xf32>
    %41 = arith.divf %39, %40 : vector<8x1xf32>
    %c0_25 = arith.constant 0 : index
    %c0_26 = arith.constant 0 : index
    %42 = vector.load %arg2[%c0_25, %c0_26] : memref<8x1xf32, #tpu.memory_space<vmem>>, vector<8x1xf32>
    %cst_27 = arith.constant 9.99999974E-6 : f32
    %43 = vector.broadcast %cst_27 : f32 to vector<8x1xf32>
    %44 = arith.addf %41, %43 : vector<8x1xf32>
    %45 = math.rsqrt %44 : vector<8x1xf32>
    %46 = arith.mulf %42, %45 : vector<8x1xf32>
    %c0_28 = arith.constant 0 : index
    %c0_29 = arith.constant 0 : index
    %47 = vector.load %arg3[%c0_28, %c0_29] : memref<8x1xf32, #tpu.memory_space<vmem>>, vector<8x1xf32>
    %48 = arith.mulf %30, %46 : vector<8x1xf32>
    %49 = arith.subf %47, %48 : vector<8x1xf32>
    %50 = vector.broadcast %46 : vector<8x1xf32> to vector<8x512xf32>
    %51 = arith.mulf %17, %50 : vector<8x512xf32>
    %52 = vector.broadcast %49 : vector<8x1xf32> to vector<8x512xf32>
    %53 = arith.addf %51, %52 : vector<8x512xf32>
    %cst_30 = arith.constant 0.000000e+00 : f32
    %54 = vector.broadcast %cst_30 : f32 to vector<8x512xf32>
    %55 = arith.maximumf %53, %54 : vector<8x512xf32>
    %56 = vector.extract_strided_slice %55 {offsets = [0, 0], sizes = [8, 256], strides = [1, 1]} : vector<8x512xf32> to vector<8x256xf32>
    %c0_31 = arith.constant 0 : index
    %c0_32 = arith.constant 0 : index
    %c0_33 = arith.constant 0 : index
    %57 = vector.load %arg4[%c0_31, %c0_32, %c0_33] : memref<2x8x256xf32, #tpu.memory_space<vmem>>, vector<1x8x256xf32>
    %58 = vector.shape_cast %57 : vector<1x8x256xf32> to vector<8x256xf32>
    %59 = vector.shape_cast %56 : vector<8x256xf32> to vector<1x8x256xf32>
    tpu.vector_store %arg4[%c0_31, %c0_32, %c0_33], %59 {strides = array<i32>} : memref<2x8x256xf32, #tpu.memory_space<vmem>>, vector<1x8x256xf32>,
    %60 = vector.extract_strided_slice %55 {offsets = [0, 256], sizes = [8, 256], strides = [1, 1]} : vector<8x512xf32> to vector<8x256xf32>
    %c1_34 = arith.constant 1 : index
    %c0_35 = arith.constant 0 : index
    %c0_36 = arith.constant 0 : index
    %61 = vector.load %arg4[%c1_34, %c0_35, %c0_36] : memref<2x8x256xf32, #tpu.memory_space<vmem>>, vector<1x8x256xf32>
    %62 = vector.shape_cast %61 : vector<1x8x256xf32> to vector<8x256xf32>
    %63 = vector.shape_cast %60 : vector<8x256xf32> to vector<1x8x256xf32>
    tpu.vector_store %arg4[%c1_34, %c0_35, %c0_36], %63 {strides = array<i32>} : memref<2x8x256xf32, #tpu.memory_space<vmem>>, vector<1x8x256xf32>,
    return
  }
}

</mosaic_0001>

<bundles_post_ra>
// kernel: conv_block_pallas.1
= control target key start
LH: loop header
LB: loop body
LE: loop exit
PB: predicated region body
PF: predicated region fallthrough
CT: control target
= control target key end

     0   :  { %s292_s19 = smov 126   ;;  %s293_s20 = smov 127   ;;  %v26_v6 = vlaneseq  ;;  %vm88_vm2 = vcmask 1043456   ;;  %vm84_vm3 = vcmask 195584   ;;  %s422_s0 = inlined_call_operand.vmem [shape: f32[2,8,256], index: 0, kind: input, shape index: {}]   ;;  %s423_s1 = inlined_call_operand.vmem [shape: bf16[8,24], index: 1, kind: input, shape index: {}]   ;;  %s424_s2 = inlined_call_operand.vmem [shape: f32[8,1], index: 2, kind: input, shape index: {}]   ;;  %s425_s3 = inlined_call_operand.vmem [shape: f32[8,1], index: 3, kind: input, shape index: {}]   ;;  %s426_s4 = inlined_call_operand.vmem [shape: f32[2,8,256], index: 4, kind: output, shape index: {}]  }
   0x1   :  { %v254_v0 = vld [vmem:[%s422_s0 + $0x10] sm:$0xff]  ;;  %v255_v1 = vld [vmem:[%s422_s0 + $0x18] sm:$0xff]  ;;  %v18_v3 = vld [vmem:[%s422_s0] sm:$0xff] }
   0x2   :  { %v266_v2 = vpack.i.bf16 %v255_v1, %v254_v0  ;;  %v19_v4 = vld [vmem:[%s422_s0 + $0x8] sm:$0xff]  ;;  %v27_v7 = vand.u32 127, %v26_v6  ;;  %v63_v30 = vld [vmem:[%s423_s1] sm:$0xf] }
   0x3   :  { %v271_v5 = vpack.i.bf16 %v19_v4, %v18_v3 }
   0x4   :  { %267 = vrot.lane.b32.xlu0 %v266_v2, %s292_s19  ;;  %277 = vrot.lane.b32.xlu1 %v266_v2, %s293_s20  ;;  %vm37_vm0 = vcmp.lt.s32.totalorder %v27_v7, 126  ;;  %vm28_vm1 = vcmp.lt.s32.totalorder %v27_v7, 127  ;;  %v153_v41 = vadd.s32 128, %v27_v7  ;;  %v154_v42 = vadd.s32 256, %v27_v7 }
   0x5   :  { %v155_v43 = vadd.s32 384, %v27_v7  ;;  %v156_v44 = vand.u32 15, %v27_v7 }
   0x6   :  { %v157_v45 = vand.u32 15, %v153_v41  ;;  %v158_v46 = vand.u32 15, %v154_v42 }
   0x7   :  { %v159_v47 = vand.u32 15, %v155_v43  ;;  %vm356_vm4 = vcmp.lt.s32.totalorder %v156_v44, 14 }
   0x8   :  { %vm360_vm5 = vcmp.lt.s32.totalorder %v157_v45, 14  ;;  %vm364_vm6 = vcmp.lt.s32.totalorder %v158_v46, 14 }
   0x9   :  { %vm372_vm7 = vcmp.lt.s32.totalorder %v159_v47, 14 }
   0xc   :  { %272 = vrot.lane.b32.xlu0 %v271_v5, %s292_s19  ;;  %282 = vrot.lane.b32.xlu1 %v271_v5, %s293_s20 }
  0x76   :  { %v268_v8 = vpop.permute.xlu0 %267  ;;  %v278_v9 = vpop.permute.xlu1 %277 }
  0x77   :  { %v270_v10 = vunpack.i.h.bf16 %v268_v8  ;;  %v269_v11 = vunpack.i.l.bf16 %v268_v8  ;;  %v280_v12 = vunpack.i.h.bf16 %v278_v9  ;;  %v279_v13 = vunpack.i.l.bf16 %v278_v9 }
  0x79   :  { %v59_v14 = vsel %vm37_vm0, %v269_v11, %v270_v10  ;;  %v60_v15 = vsel %vm37_vm0, %v270_v10, %v269_v11  ;;  %v51_v18 = vsel %vm28_vm1, %v279_v13, %v280_v12  ;;  %v52_v19 = vsel %vm28_vm1, %v280_v12, %v279_v13 }
  0x7a   :  { %v82_v16 = vpack.c.bf16 %v59_v14, %v59_v14  ;;  %v83_v17 = vpack.c.bf16 %v60_v15, %v60_v15  ;;  %v78_v22 = vpack.c.bf16 %v51_v18, %v254_v0  ;;  %v79_v23 = vpack.c.bf16 %v52_v19, %v255_v1 }
  0x7c   :  { %v96_v20 = vsel %vm88_vm2, %v82_v16, 0  ;;  %v99_v21 = vsel %vm88_vm2, %v83_v17, 0 }
  0x7d   :  { %133 = vmatpush.bf16.msra.mxu2 %v96_v20  ;;  %146 = vmatpush.bf16.msra.mxu3 %v99_v21 }
  0x7e   :  { %v273_v24 = vpop.permute.xlu0 %272  ;;  %v283_v25 = vpop.permute.xlu1 %282 }
  0x7f   :  { %v275_v26 = vunpack.i.h.bf16 %v273_v24  ;;  %v274_v27 = vunpack.i.l.bf16 %v273_v24  ;;  %v285_v28 = vunpack.i.h.bf16 %v283_v25  ;;  %v284_v29 = vunpack.i.l.bf16 %v283_v25 }
  0x81   :  { %134 = vmatpush.bf16.msra.mxu2 %v78_v22  ;;  %147 = vmatpush.bf16.msra.mxu3 %v79_v23  ;;  %v38_v31 = vsel %vm37_vm0, %v274_v27, %v275_v26  ;;  %v39_v32 = vsel %vm37_vm0, %v275_v26, %v274_v27  ;;  %v29_v35 = vsel %vm28_vm1, %v284_v29, %v285_v28  ;;  %v295_v27 = vmov 0  }
  0x82   :  { %v80_v33 = vpack.c.bf16 %v38_v31, %v38_v31  ;;  %v81_v34 = vpack.c.bf16 %v39_v32, %v39_v32  ;;  %v30_v36 = vsel %vm28_vm1, %v285_v28, %v284_v29  ;;  %v76_v39 = vpack.c.bf16 %v29_v35, %v18_v3  ;;  %286 = vset.pattern.permute.xlu0 %v295_v27 }
  0x83   :  { %v77_v40 = vpack.c.bf16 %v30_v36, %v19_v4  ;;  %v294_v3 = vmov 448.0   ;;  %287 = vset.pattern.permute.xlu1 %v295_v27  ;;  %v207_v36 = vld [vmem:[%s424_s2] sm:$0xff] }
  0x84   :  { %258 = vmatmul.msk.bf16.vlgmr.msra.gmra.mxu2 %vm84_vm3, %v63_v30  ;;  %259 = vmatmul.msk.bf16.vlgmr.msra.gmra.mxu3 %vm84_vm3, %v63_v30  ;;  %v90_v37 = vsel %vm88_vm2, %v80_v33, 0  ;;  %v93_v38 = vsel %vm88_vm2, %v81_v34, 0  ;;  %288 = vrcp.f32 %v294_v3 }
  0x85   :  { %107 = vmatpush.bf16.msra.mxu0 %v90_v37  ;;  %120 = vmatpush.bf16.msra.mxu1 %v93_v38 }
  0x89   :  { %108 = vmatpush.bf16.msra.mxu0 %v76_v39  ;;  %121 = vmatpush.bf16.msra.mxu1 %v77_v40  ;;  %v220_v40 = vld [vmem:[%s425_s3] sm:$0xff] }
  0x8a   :  { %v289_v4 = vpop.eup %288 }
  0x8b   :  { %v182_v5 = vmul.f32 448.0, %v289_v4  ;;  %vm186_vm8 = vweird.f32 %v289_v4 }
  0x8c   :  { %256 = vmatmul.msk.bf16.vlgmr.msra.gmra.mxu0 %vm84_vm3, %v63_v30  ;;  %257 = vmatmul.msk.bf16.vlgmr.msra.gmra.mxu1 %vm84_vm3, %v63_v30 }
  0x8d   :  { %v183_v6 = vsub.f32 1.0, %v182_v5 }
  0x8f   :  { %v184_v7 = vmul.f32 %v289_v4, %v183_v6 }
  0x91   :  { %v185_v8 = vadd.f32 %v289_v4, %v184_v7 }
  0x93   :  { %v187_v9 = vsel %vm186_vm8, %v289_v4, %v185_v8 }
 0x107   :  { %v352_v48 = vpop.f32.mrf.mxu2  ;;  %v354_v49 = vpop.f32.mrf.mxu3 }
 0x108   :  { %v174_v58 = vsel %vm364_vm6, %v352_v48, 0.0  ;;  %v175_v60 = vsel %vm372_vm7, %v354_v49, 0.0 }
 0x109   :  { %v368_v53 = vpop.f32.mrf.mxu0  ;;  %v370_v54 = vpop.f32.mrf.mxu1 }
 0x10a   :  { %v172_v56 = vsel %vm356_vm4, %v368_v53, 0.0  ;;  %v173_v57 = vsel %vm360_vm5, %v370_v54, 0.0 }
 0x10b   :  { %v176_v59 = vadd.f32 %v173_v57, %v172_v56 }
 0x10d   :  { %v177_v61 = vadd.f32 %v176_v59, %v174_v58 }
 0x10f   :  { %v138_v62 = vpop.f32.mrf.mxu2  ;;  %v151_v63 = vpop.f32.mrf.mxu3  ;;  %v178_v0 = vadd.f32 %v177_v61, %v175_v60 }
 0x111   :  { %v125_v1 = vpop.f32.mrf.mxu1  ;;  %179 = vadd.xlane.f32.xlu2 %v178_v0  ;;  %v112_v2 = vpop.f32.mrf.mxu0 }
 0x184   :  { %v180_v10 = vpop.xlane.xlu2 %179 }
 0x185   :  { %v188_v11 = vmul.f32 %v187_v9, %v180_v10 }
 0x187   :  { %v189_v12 = vsub.f32 %v368_v53, %v188_v11  ;;  %v190_v13 = vsub.f32 %v370_v54, %v188_v11  ;;  %v191_v14 = vsub.f32 %v352_v48, %v188_v11  ;;  %v192_v15 = vsub.f32 %v354_v49, %v188_v11 }
 0x189   :  { %v193_v16 = vsel %vm356_vm4, %v189_v12, 0.0  ;;  %v194_v17 = vsel %vm360_vm5, %v190_v13, 0.0  ;;  %v195_v18 = vsel %vm364_vm6, %v191_v14, 0.0  ;;  %v196_v21 = vsel %vm372_vm7, %v192_v15, 0.0 }
 0x18a   :  { %v197_v19 = vmul.f32 %v193_v16, %v193_v16  ;;  %v198_v20 = vmul.f32 %v194_v17, %v194_v17  ;;  %v199_v22 = vmul.f32 %v195_v18, %v195_v18  ;;  %v200_v24 = vmul.f32 %v196_v21, %v196_v21 }
 0x18c   :  { %v201_v23 = vadd.f32 %v198_v20, %v197_v19 }
 0x18e   :  { %v202_v25 = vadd.f32 %v201_v23, %v199_v22 }
 0x190   :  { %v203_v26 = vadd.f32 %v202_v25, %v200_v24 }
 0x192   :  { %204 = vadd.xlane.f32.xlu2 %v203_v26 }
 0x205   :  { %v205_v28 = vpop.xlane.xlu2 %204 }
 0x206   :  { %v206_v29 = vmul.f32 %v205_v28, %v187_v9 }
 0x208   :  { %v208_v30 = vadd.f32 1e-05, %v206_v29 }
 0x20a   :  { %290 = vrsqrt.f32 %v208_v30  ;;  %vm215_vm10 = vweird.f32 %v208_v30 }
 0x210   :  { %v291_v31 = vpop.eup %290 }
 0x211   :  { %v210_v32 = vmul.f32 %v291_v31, %v208_v30  ;;  %vm216_vm9 = vweird.f32 %v291_v31 }
 0x212   :  { %vm217_vm11 = vmor %vm215_vm10, %vm216_vm9 }
 0x213   :  { %v211_v33 = vmul.f32 %v291_v31, %v210_v32 }
 0x215   :  { %v212_v34 = vmul.f32 0.5, %v211_v33 }
 0x217   :  { %v213_v35 = vsub.f32 1.5, %v212_v34 }
 0x219   :  { %v214_v37 = vmul.f32 %v291_v31, %v213_v35 }
 0x21b   :  { %v218_v38 = vsel %vm217_vm11, %v291_v31, %v214_v37 }
 0x21c   :  { %v219_v39 = vmul.f32 %v218_v38, %v207_v36 }
 0x21e   :  { %225 = vperm.xlu0 %286, %v219_v39   ;;  %v221_v41 = vmul.f32 %v219_v39, %v188_v11 }
 0x220   :  { %v222_v42 = vsub.f32 %v220_v40, %v221_v41 }
 0x222   :  { %234 = vperm.xlu1 %287, %v222_v42  }
 0x290   :  { %v226_v43 = vpop.permute.xlu0 %225 }
 0x291   :  { %v228_v44 = vmul.f32 %v226_v43, %v368_v53  ;;  %v229_v45 = vmul.f32 %v226_v43, %v370_v54  ;;  %v230_v46 = vmul.f32 %v226_v43, %v352_v48  ;;  %v231_v47 = vmul.f32 %v226_v43, %v354_v49 }
 0x294   :  { %v235_v50 = vpop.permute.xlu1 %234 }
 0x295   :  { %v237_v51 = vadd.f32 %v235_v50, %v228_v44  ;;  %v238_v52 = vadd.f32 %v235_v50, %v229_v45  ;;  %v239_v55 = vadd.f32 %v235_v50, %v230_v46  ;;  %v240_v56 = vadd.f32 %v235_v50, %v231_v47 }
 0x297   :  { %v241_v57 = vmax.f32 %v237_v51, 0.0  ;;  %v242_v58 = vmax.f32 %v238_v52, 0.0  ;;  %v243_v59 = vmax.f32 %v239_v55, 0.0  ;;  %v244_v60 = vmax.f32 %v240_v56, 0.0 }
 0x299   :  { %245 = vst [vmem:[%s426_s4] sm:$0xff] %v241_v57 }
 0x29a   :  { %246 = vst [vmem:[%s426_s4 + $0x8] sm:$0xff] %v242_v58 }
 0x29b   :  { %260 = vst [vmem:[%s426_s4 + $0x10] sm:$0xff] %v243_v59 }
 0x29c   :  { %261 = vst [vmem:[%s426_s4 + $0x18] sm:$0xff] %v244_v60 }

</bundles_post_ra>
